<compile_context>
chip_gen: v6e
topology: v6e:2x2x1
jax: 0.10.0
libtpu: 0.0.40
codegen_flags: <defaults>
</compile_context>

<pallas_src>
import jax
import jax.numpy as jnp
from jax.experimental import pallas as pl
from jax.experimental.pallas import tpu as pltpu


def _silu_f32(h):
    # SiLU in f32: VPU mul + EUP sigmoid (f32 is the fast path on all of v5e/v6e/v7x).
    return h * jax.nn.sigmoid(h)


def mlp_kernel(x_ref,              # (2, TM)  f32
               w1_ref, b1_ref,     # (H, 2) f32, (H, 1) f32
               w2_ref, b2_ref,     # (H, H) bf16, (H, 1) f32
               w3_ref, b3_ref,     # (H, H) bf16, (H, 1) f32
               w4_ref, b4_ref,     # (1, H) f32,  (1, 1) f32 in SMEM
               o_ref):             # (1, TM) f32
    x = x_ref[...]                 # (2, TM)
    w1 = w1_ref[...]               # (H, 2)

    # ---- Layer 1: K=2 contraction as two broadcast FMAs on the VPU (no MXU) ----
    h = (w1[:, 0:1] * x[0:1, :]    # (H,1)*(1,TM) -> (H,TM)
         + w1[:, 1:2] * x[1:2, :]
         + b1_ref[...])            # (H,1) broadcasts across lanes
    h = _silu_f32(h)

    # ---- Layers 2 & 3: H x H matmuls, bf16 operands, f32 accumulation ----------
    h = jnp.dot(w2_ref[...], h.astype(jnp.bfloat16),
                preferred_element_type=jnp.float32) + b2_ref[...]
    h = _silu_f32(h)

    h = jnp.dot(w3_ref[...], h.astype(jnp.bfloat16),
                preferred_element_type=jnp.float32) + b3_ref[...]
    h = _silu_f32(h)

    # ---- Layer 4: (1,H) @ (H,TM) -> lane-dense (1,TM); scalar bias from SMEM ----
    out = jnp.dot(w4_ref[...], h, preferred_element_type=jnp.float32) + b4_ref[0, 0]
    o_ref[...] = out.astype(o_ref.dtype)


def net_forward(features, params, tm=1024):
    """features: (N, 2) f32.  Returns (N, 1) f32, matching Net.forward."""
    n = features.shape[0]
    H = params["w2"].shape[0]

    # Tile along the lane (sample) dimension; tm must be a multiple of 128.
    tm = min(tm, max(128, pl.cdiv(n, 128) * 128))
    padded_n = pl.cdiv(n, tm) * tm
    grid = (padded_n // tm,)

    # Lane-dense layout: (2, padded_N), zero-padded ragged tail.
    x_t = jnp.pad(features.T.astype(jnp.float32), ((0, 0), (0, padded_n - n)))

    w1, b1 = params["w1"], params["b1"]
    w2, b2 = params["w2"], params["b2"]
    w3, b3 = params["w3"], params["b3"]
    w4, b4 = params["w4"], params["b4"]

    bytes_accessed = int(
        padded_n * (2 + 1) * 4                      # streamed features + output (f32)
        + w1.size * 4 + w4.size * 4                 # f32 weights
        + (w2.size + w3.size) * 2                   # bf16 weights
        + (b1.size + b2.size + b3.size + b4.size) * 4
    )
    cost = pl.CostEstimate(
        flops=int(2 * padded_n * (2 * H + 2 * H * H + H)),
        transcendentals=int(3 * padded_n * H),
        bytes_accessed=bytes_accessed,
    )

    weight_spec = lambda shape: pl.BlockSpec(shape, lambda i: (0, 0))

    out = pl.pallas_call(
        mlp_kernel,
        out_shape=jax.ShapeDtypeStruct((1, padded_n), jnp.float32),
        grid_spec=pltpu.PrefetchScalarGridSpec(
            num_scalar_prefetch=0,
            grid=grid,
            in_specs=[
                pl.BlockSpec((2, tm), lambda i: (0, i)),      # features tile
                weight_spec((H, 2)),                          # w1 (resident)
                weight_spec((H, 1)),                          # b1
                weight_spec((H, H)),                          # w2 (bf16)
                weight_spec((H, 1)),                          # b2
                weight_spec((H, H)),                          # w3 (bf16)
                weight_spec((H, 1)),                          # b3
                weight_spec((1, H)),                          # w4
                pl.BlockSpec(memory_space=pltpu.MemorySpace.SMEM),  # b4 scalar
            ],
            out_specs=pl.BlockSpec((1, tm), lambda i: (0, i)),
        ),
        compiler_params=pltpu.CompilerParams(
            dimension_semantics=("parallel",),      # shards row tiles across TCs on v7x
            vmem_limit_bytes=32 * 1024 * 1024,      # explicit bound, safe on v7x 64 MiB VMEM
        ),
        cost_estimate=cost,
    )(x_t, w1, b1, w2, b2, w3, b3, w4, b4)

    return out[:, :n].T  # (N, 1)


def ref_forward(features, params):
    """Plain-JAX reference mirroring the kernel math (same bf16 casts)."""
    xt = features.T.astype(jnp.float32)                                   # (2, N)
    h = params["w1"] @ xt + params["b1"]
    h = h * jax.nn.sigmoid(h)
    h = jnp.dot(params["w2"], h.astype(jnp.bfloat16),
                preferred_element_type=jnp.float32) + params["b2"]
    h = h * jax.nn.sigmoid(h)
    h = jnp.dot(params["w3"], h.astype(jnp.bfloat16),
                preferred_element_type=jnp.float32) + params["b3"]
    h = h * jax.nn.sigmoid(h)
    out = params["w4"] @ h + params["b4"]
    return out.T                                                          # (N, 1)


def init_params(key, hidden_size):
    """Deterministic init in PyTorch nn.Linear layout (out_features, in_features).

    Biases stored as (out, 1) for lane-broadcast inside the kernel.
    Hidden weights (w2, w3) are kept in bf16 (matmul operands); everything else f32.
    """
    ks = jax.random.split(key, 8)
    H = hidden_size

    def uniform(k, shape, fan_in):
        bound = 1.0 / jnp.sqrt(fan_in)
        return jax.random.uniform(k, shape, jnp.float32, -bound, bound)

    return {
        "w1": uniform(ks[0], (H, 2), 2),
        "b1": uniform(ks[1], (H, 1), 2),
        "w2": uniform(ks[2], (H, H), H).astype(jnp.bfloat16),
        "b2": uniform(ks[3], (H, 1), H),
        "w3": uniform(ks[4], (H, H), H).astype(jnp.bfloat16),
        "b3": uniform(ks[5], (H, 1), H),
        "w4": uniform(ks[6], (1, H), H),
        "b4": uniform(ks[7], (1, 1), H),
    }


if __name__ == "__main__":
    # TODO(synk): LBFGS optimizer / MSELoss / training loop are not part of the
    # forward pass and are not implemented here.
    hidden_size = 32
    n_samples = 8

    key = jax.random.PRNGKey(0)
    k_params, k_x, k_y = jax.random.split(key, 3)

    params = init_params(k_params, hidden_size)

    # Mirrors Net.predict: features = vstack([x, y]).T  -> (N, 2)
    x = jax.random.normal(k_x, (n_samples,), jnp.float32)
    y = jax.random.normal(k_y, (n_samples,), jnp.float32)
    features = jnp.stack([x, y], axis=1)  # (N, 2)

    out = net_forward(features, params)
    out = jax.block_until_ready(out)

    ref = ref_forward(features, params)
    assert out.shape == (n_samples, 1)
    assert jnp.allclose(out, ref, atol=1e-3, rtol=1e-3), (out, ref)

    print("KERNEL_OK")
</pallas_src>

<mosaic_0001>
module attributes {stable_mosaic.version = 11 : i64} {
  func.func @mlp_kernel(%arg0: i32, %arg1: memref<2x128xf32, #tpu.memory_space<vmem>>, %arg2: memref<32x2xf32, #tpu.memory_space<vmem>>, %arg3: memref<32x1xf32, #tpu.memory_space<vmem>>, %arg4: memref<32x32xbf16, #tpu.memory_space<vmem>>, %arg5: memref<32x1xf32, #tpu.memory_space<vmem>>, %arg6: memref<32x32xbf16, #tpu.memory_space<vmem>>, %arg7: memref<32x1xf32, #tpu.memory_space<vmem>>, %arg8: memref<1x32xf32, #tpu.memory_space<vmem>>, %arg9: memref<1x1xf32, #tpu.memory_space<smem>>, %arg10: memref<1x128xf32, #tpu.memory_space<vmem>>) attributes {dimension_semantics = [#tpu.dimension_semantics<parallel>], iteration_bounds = array<i64: 1>, scalar_prefetch = 0 : i64, scratch_operands = 0 : i64, tpu.core_type = #tpu.core_type<tc>, window_params = [{transform_indices = @transform_0, window_bounds = array<i64: 2, 128>}, {pipeline_mode = #tpu.pipeline_mode<synchronous>, transform_indices = @transform_1, window_bounds = array<i64: 32, 2>}, {pipeline_mode = #tpu.pipeline_mode<synchronous>, transform_indices = @transform_2, window_bounds = array<i64: 32, 1>}, {pipeline_mode = #tpu.pipeline_mode<synchronous>, transform_indices = @transform_3, window_bounds = array<i64: 32, 32>}, {pipeline_mode = #tpu.pipeline_mode<synchronous>, transform_indices = @transform_4, window_bounds = array<i64: 32, 1>}, {pipeline_mode = #tpu.pipeline_mode<synchronous>, transform_indices = @transform_5, window_bounds = array<i64: 32, 32>}, {pipeline_mode = #tpu.pipeline_mode<synchronous>, transform_indices = @transform_6, window_bounds = array<i64: 32, 1>}, {pipeline_mode = #tpu.pipeline_mode<synchronous>, transform_indices = @transform_7, window_bounds = array<i64: 1, 32>}, {transform_indices = @transform_8, window_bounds = array<i64: 1, 1>}, {transform_indices = @transform_9, window_bounds = array<i64: 1, 128>}]} {
    %c0 = arith.constant 0 : index
    %c0_0 = arith.constant 0 : index
    %0 = vector.load %arg1[%c0, %c0_0] : memref<2x128xf32, #tpu.memory_space<vmem>>, vector<2x128xf32>
    %c0_1 = arith.constant 0 : index
    %c0_2 = arith.constant 0 : index
    %1 = vector.load %arg2[%c0_1, %c0_2] : memref<32x2xf32, #tpu.memory_space<vmem>>, vector<32x2xf32>
    %2 = vector.extract_strided_slice %1 {offsets = [0, 0], sizes = [32, 1], strides = [1, 1]} : vector<32x2xf32> to vector<32x1xf32>
    %3 = vector.extract_strided_slice %0 {offsets = [0, 0], sizes = [1, 128], strides = [1, 1]} : vector<2x128xf32> to vector<1x128xf32>
    %4 = vector.broadcast %2 : vector<32x1xf32> to vector<32x128xf32>
    %5 = vector.broadcast %3 : vector<1x128xf32> to vector<32x128xf32>
    %6 = arith.mulf %4, %5 : vector<32x128xf32>
    %7 = vector.extract_strided_slice %1 {offsets = [0, 1], sizes = [32, 1], strides = [1, 1]} : vector<32x2xf32> to vector<32x1xf32>
    %8 = vector.extract_strided_slice %0 {offsets = [1, 0], sizes = [1, 128], strides = [1, 1]} : vector<2x128xf32> to vector<1x128xf32>
    %9 = vector.broadcast %7 : vector<32x1xf32> to vector<32x128xf32>
    %10 = vector.broadcast %8 : vector<1x128xf32> to vector<32x128xf32>
    %11 = arith.mulf %9, %10 : vector<32x128xf32>
    %12 = arith.addf %6, %11 : vector<32x128xf32>
    %c0_3 = arith.constant 0 : index
    %c0_4 = arith.constant 0 : index
    %13 = vector.load %arg3[%c0_3, %c0_4] : memref<32x1xf32, #tpu.memory_space<vmem>>, vector<32x1xf32>
    %14 = vector.broadcast %13 : vector<32x1xf32> to vector<32x128xf32>
    %15 = arith.addf %12, %14 : vector<32x128xf32>
    %16 = arith.negf %15 : vector<32x128xf32>
    %17 = math.exp %16 : vector<32x128xf32>
    %cst = arith.constant 1.000000e+00 : f32
    %18 = vector.broadcast %cst : f32 to vector<32x128xf32>
    %19 = arith.addf %18, %17 : vector<32x128xf32>
    %20 = arith.divf %18, %19 : vector<32x128xf32>
    %21 = arith.mulf %15, %20 : vector<32x128xf32>
    %c0_5 = arith.constant 0 : index
    %c0_6 = arith.constant 0 : index
    %22 = vector.load %arg4[%c0_5, %c0_6] : memref<32x32xbf16, #tpu.memory_space<vmem>>, vector<32x32xbf16>
    %23 = arith.truncf %21 : vector<32x128xf32> to vector<32x128xbf16>
    %cst_7 = arith.constant dense<0.000000e+00> : vector<32x128xf32>
    %24 = tpu.matmul %22, %23, %cst_7 {dimension_numbers = #tpu.dot_dimension_numbers<[1], [0], [0], [1], [0, 0, 1, 1], [], []>} : vector<32x32xbf16>, vector<32x128xbf16>, vector<32x128xf32> -> vector<32x128xf32>
    %c0_8 = arith.constant 0 : index
    %c0_9 = arith.constant 0 : index
    %25 = vector.load %arg5[%c0_8, %c0_9] : memref<32x1xf32, #tpu.memory_space<vmem>>, vector<32x1xf32>
    %26 = vector.broadcast %25 : vector<32x1xf32> to vector<32x128xf32>
    %27 = arith.addf %24, %26 : vector<32x128xf32>
    %28 = arith.negf %27 : vector<32x128xf32>
    %29 = math.exp %28 : vector<32x128xf32>
    %cst_10 = arith.constant 1.000000e+00 : f32
    %30 = vector.broadcast %cst_10 : f32 to vector<32x128xf32>
    %31 = arith.addf %30, %29 : vector<32x128xf32>
    %32 = arith.divf %30, %31 : vector<32x128xf32>
    %33 = arith.mulf %27, %32 : vector<32x128xf32>
    %c0_11 = arith.constant 0 : index
    %c0_12 = arith.constant 0 : index
    %34 = vector.load %arg6[%c0_11, %c0_12] : memref<32x32xbf16, #tpu.memory_space<vmem>>, vector<32x32xbf16>
    %35 = arith.truncf %33 : vector<32x128xf32> to vector<32x128xbf16>
    %cst_13 = arith.constant dense<0.000000e+00> : vector<32x128xf32>
    %36 = tpu.matmul %34, %35, %cst_13 {dimension_numbers = #tpu.dot_dimension_numbers<[1], [0], [0], [1], [0, 0, 1, 1], [], []>} : vector<32x32xbf16>, vector<32x128xbf16>, vector<32x128xf32> -> vector<32x128xf32>
    %c0_14 = arith.constant 0 : index
    %c0_15 = arith.constant 0 : index
    %37 = vector.load %arg7[%c0_14, %c0_15] : memref<32x1xf32, #tpu.memory_space<vmem>>, vector<32x1xf32>
    %38 = vector.broadcast %37 : vector<32x1xf32> to vector<32x128xf32>
    %39 = arith.addf %36, %38 : vector<32x128xf32>
    %40 = arith.negf %39 : vector<32x128xf32>
    %41 = math.exp %40 : vector<32x128xf32>
    %cst_16 = arith.constant 1.000000e+00 : f32
    %42 = vector.broadcast %cst_16 : f32 to vector<32x128xf32>
    %43 = arith.addf %42, %41 : vector<32x128xf32>
    %44 = arith.divf %42, %43 : vector<32x128xf32>
    %45 = arith.mulf %39, %44 : vector<32x128xf32>
    %c0_17 = arith.constant 0 : index
    %c0_18 = arith.constant 0 : index
    %46 = vector.load %arg8[%c0_17, %c0_18] : memref<1x32xf32, #tpu.memory_space<vmem>>, vector<1x32xf32>
    %cst_19 = arith.constant dense<0.000000e+00> : vector<1x128xf32>
    %47 = tpu.matmul %46, %45, %cst_19 {dimension_numbers = #tpu.dot_dimension_numbers<[1], [0], [0], [1], [0, 0, 1, 1], [], []>} : vector<1x32xf32>, vector<32x128xf32>, vector<1x128xf32> -> vector<1x128xf32>
    %c0_20 = arith.constant 0 : index
    %c0_21 = arith.constant 0 : index
    %48 = memref.load %arg9[%c0_20, %c0_21] : memref<1x1xf32, #tpu.memory_space<smem>>
    %49 = vector.broadcast %48 : f32 to vector<1x128xf32>
    %50 = arith.addf %47, %49 : vector<1x128xf32>
    %c0_22 = arith.constant 0 : index
    %c0_23 = arith.constant 0 : index
    %51 = vector.load %arg10[%c0_22, %c0_23] : memref<1x128xf32, #tpu.memory_space<vmem>>, vector<1x128xf32>
    tpu.vector_store %arg10[%c0_22, %c0_23], %50 {strides = array<i32>} : memref<1x128xf32, #tpu.memory_space<vmem>>, vector<1x128xf32>,
    return
  }
  func.func @transform_0(%arg0: i32) -> (i32, i32) {
    %c0_i32 = arith.constant 0 : i32
    %c0_i32_0 = arith.constant 0 : i32
    return %c0_i32, %arg0 : i32, i32
  }
  func.func @transform_1(%arg0: i32) -> (i32, i32) {
    %c0_i32 = arith.constant 0 : i32
    %c0_i32_0 = arith.constant 0 : i32
    %c0_i32_1 = arith.constant 0 : i32
    return %c0_i32, %c0_i32_0 : i32, i32
  }
  func.func @transform_2(%arg0: i32) -> (i32, i32) {
    %c0_i32 = arith.constant 0 : i32
    %c0_i32_0 = arith.constant 0 : i32
    %c0_i32_1 = arith.constant 0 : i32
    return %c0_i32, %c0_i32_0 : i32, i32
  }
  func.func @transform_3(%arg0: i32) -> (i32, i32) {
    %c0_i32 = arith.constant 0 : i32
    %c0_i32_0 = arith.constant 0 : i32
    %c0_i32_1 = arith.constant 0 : i32
    return %c0_i32, %c0_i32_0 : i32, i32
  }
  func.func @transform_4(%arg0: i32) -> (i32, i32) {
    %c0_i32 = arith.constant 0 : i32
    %c0_i32_0 = arith.constant 0 : i32
    %c0_i32_1 = arith.constant 0 : i32
    return %c0_i32, %c0_i32_0 : i32, i32
  }
  func.func @transform_5(%arg0: i32) -> (i32, i32) {
    %c0_i32 = arith.constant 0 : i32
    %c0_i32_0 = arith.constant 0 : i32
    %c0_i32_1 = arith.constant 0 : i32
    return %c0_i32, %c0_i32_0 : i32, i32
  }
  func.func @transform_6(%arg0: i32) -> (i32, i32) {
    %c0_i32 = arith.constant 0 : i32
    %c0_i32_0 = arith.constant 0 : i32
    %c0_i32_1 = arith.constant 0 : i32
    return %c0_i32, %c0_i32_0 : i32, i32
  }
  func.func @transform_7(%arg0: i32) -> (i32, i32) {
    %c0_i32 = arith.constant 0 : i32
    %c0_i32_0 = arith.constant 0 : i32
    %c0_i32_1 = arith.constant 0 : i32
    return %c0_i32, %c0_i32_0 : i32, i32
  }
  func.func @transform_8(%arg0: i32) -> (i32, i32) {
    %c0_i32 = arith.constant 0 : i32
    %c0_i32_0 = arith.constant 0 : i32
    %c0_i32_1 = arith.constant 0 : i32
    return %c0_i32, %c0_i32_0 : i32, i32
  }
  func.func @transform_9(%arg0: i32) -> (i32, i32) {
    %c0_i32 = arith.constant 0 : i32
    %c0_i32_0 = arith.constant 0 : i32
    return %c0_i32, %arg0 : i32, i32
  }
}

</mosaic_0001>

<bundles_post_ra>
// kernel: tpu_custom_call.1
= control target key start
LH: loop header
LB: loop body
LE: loop exit
PB: predicated region body
PF: predicated region fallthrough
CT: control target
= control target key end

     0   :  { %v636_v2 = vmov 1   ;;  %v637_v4 = vmov 0   ;;  %s768_s0 = inlined_call_operand.vmem [shape: f32[2,128], index: 0, kind: input, shape index: {}]   ;;  %s769_s1 = inlined_call_operand.vmem [shape: f32[32,2], index: 1, kind: input, shape index: {}]   ;;  %s770_s2 = inlined_call_operand.vmem [shape: f32[32,1], index: 2, kind: input, shape index: {}]   ;;  %s771_s3 = inlined_call_operand.vmem [shape: bf16[32,32], index: 3, kind: input, shape index: {}]   ;;  %s772_s4 = inlined_call_operand.vmem [shape: f32[32,1], index: 4, kind: input, shape index: {}]   ;;  %s773_s5 = inlined_call_operand.vmem [shape: bf16[32,32], index: 5, kind: input, shape index: {}]   ;;  %s774_s6 = inlined_call_operand.vmem [shape: f32[32,1], index: 6, kind: input, shape index: {}]   ;;  %s775_s7 = inlined_call_operand.vmem [shape: f32[1,32], index: 7, kind: input, shape index: {}]   ;;  %s776_s8 = inlined_call_operand.<no memory space> [shape: f32[1,1], index: 8, kind: input, shape index: {}]   ;;  %s777_s9 = inlined_call_operand.hbm [shape: f32[1,128], index: 9, kind: output, shape index: {}]  }
   0x1   :  { %v38_v0 = vld [vmem:[%s769_s1 + $0x10] sm:$0xff]  ;;  %v36_v1 = vld [vmem:[%s769_s1] sm:$0xff]  ;;  %558 = vset.pattern.permute.xlu0 %v636_v2  ;;  %556 = vset.pattern.permute.xlu1 %v636_v2  ;;  %v39_v3 = vld [vmem:[%s769_s1 + $0x18] sm:$0xff] }
   0x2   :  { %77 = vperm.xlu1 %556, %v38_v0   ;;  %69 = vperm.xlu0 %558, %v36_v1   ;;  %v37_v5 = vld [vmem:[%s769_s1 + $0x8] sm:$0xff] }
   0x6   :  { %81 = vperm.xlu1 %556, %v39_v3   ;;  %559 = vset.pattern.permute.xlu0 %v637_v4 }
   0x7   :  { %52 = vperm.xlu0 %559, %v38_v0  }
   0x8   :  { %15 = vsyncpa [#allocation4], 0  ;;  %v99_v6 = vld [vmem:[%s770_s2 + $0x18] sm:$0xff]  ;;  %v98_v7 = vld [vmem:[%s770_s2 + $0x10] sm:$0xff]  ;;  %vm192_vm0 = vcmask 261120   ;;  %v60_v19 = vlaneseq  ;;  %vm639_vm1 = vmmov 0  }
   0x9   :  { %v160_v8 = vld [vmem:[%s772_s4 + $0x10] sm:$0xff]  ;;  %v96_v9 = vld [vmem:[%s770_s2] sm:$0xff]  ;;  %v97_v11 = vld [vmem:[%s770_s2 + $0x8] sm:$0xff]  ;;  %s640_s26 = smov [#allocation3]  }
   0xa   :  { %557 = vset.pattern.permute.xlu1 %v637_v4  ;;  %v158_v10 = vld [vmem:[%s772_s4] sm:$0xff]  ;;  %v285_v12 = vld [vmem:[%s774_s6 + $0x18] sm:$0xff]  ;;  %v283_v14 = vld [vmem:[%s774_s6 + $0x8] sm:$0xff]  ;;  %v61_v22 = vshrl.u32 %v60_v19, 7  ;;  %s482_s27 = sshll.u32 %s640_s26, 4  ;;  %s483_s27 = int_to_ptr.vmem [resolvable:$true] %s482_s27 }
   0xb   :  { %47 = vperm.xlu1 %557, %v37_v5   ;;  %57 = vperm.xlu0 %559, %v39_v3   ;;  %v161_v13 = vld [vmem:[%s772_s4 + $0x18] sm:$0xff]  ;;  %v159_v15 = vld [vmem:[%s772_s4 + $0x8] sm:$0xff]  ;;  %v284_v16 = vld [vmem:[%s774_s6 + $0x10] sm:$0xff]  ;;  %s614_s28 = scalar_lea.vmem %s483_s27, 16  ;;  %s618_s29 = scalar_lea.vmem %s483_s27, 32 }
   0xc   :  { %v282_v17 = vld [vmem:[%s774_s6] sm:$0xff]  ;;  %v62_v25 = vsub.s32 0, %v61_v22  ;;  %v86_v26 = vsub.s32 1, %v61_v22  ;;  %p615_p0 = scmp.ne.s32.totalorder %s483_s27, %s614_s28  ;;  %p619_p1 = scmp.lt.s32.totalorder %s483_s27, %s483_s27 }
   0xd   :  { %v562_v18 = vld [vmem:[%s771_s3] sm:$0xff]   ;;  %p620_p2 = scmp.lt.s32.totalorder %s618_s29, %s614_s28 }
   0xe   :  { %528 = vmatprep.mubr.msk.bf16.mxu0 %vm192_vm0, %v562_v18  ;;  %v35_v27 = vld [vmem:[%s768_s0] sm:$0x3] }
   0xf   :  { %560 = vset.pattern.permute.xlu1 %v636_v2  ;;  %42 = vperm.xlu0 %559, %v36_v1   ;;  %v63_v30 = vrot.slane %v35_v27, %v62_v25  ;;  %v87_v31 = vrot.slane %v35_v27, %v86_v26  ;;  %p621_p3 = por %p620_p2, %p619_p1 }
  0x10   :  { %73 = vperm.xlu1 %560, %v37_v5  }
  0x11   :  { %p622_p4 = pnand %p621_p3, %p615_p0 }
  0x13   :  { %117 = vperm.xlu0 %559, %v99_v6  }
  0x14   :  { %561 = vset.pattern.permute.xlu1 %v637_v4 }
  0x15   :  { %112 = vperm.xlu1 %561, %v98_v7  }
  0x17   :  { %174 = vperm.xlu0 %559, %v160_v8  }
  0x19   :  { %102 = vperm.xlu1 %561, %v96_v9  }
  0x1b   :  { %164 = vperm.xlu0 %559, %v158_v10  }
  0x1d   :  { %107 = vperm.xlu1 %561, %v97_v11  }
  0x1f   :  { %303 = vperm.xlu0 %559, %v285_v12   ;;  %v563_v12 = vld [vmem:[%s771_s3 + $0x8] sm:$0xff]  }
  0x21   :  { %179 = vperm.xlu1 %561, %v161_v13   ;;  %v564_v13 = vld [vmem:[%s773_s5] sm:$0xff]  }
  0x22   :  { %536 = vmatprep.mubr.msk.bf16.mxu1 %vm192_vm0, %v564_v13 }
  0x23   :  { %293 = vperm.xlu0 %559, %v283_v14  }
  0x25   :  { %169 = vperm.xlu1 %561, %v159_v15  }
  0x29   :  { %298 = vperm.xlu1 %561, %v284_v16  }
  0x2d   :  { %288 = vperm.xlu1 %561, %v282_v17  }
  0x7d   :  { %v78_v20 = vpop.permute.xlu1 %77  ;;  %v70_v21 = vpop.permute.xlu0 %69 }
  0x7e   :  { %v90_v37 = vmul.f32 %v87_v31, %v78_v20  ;;  %v88_v44 = vmul.f32 %v87_v31, %v70_v21 }
  0x81   :  { %v82_v23 = vpop.permute.xlu1 %81 }
  0x82   :  { %v53_v24 = vpop.permute.xlu0 %52  ;;  %v91_v34 = vmul.f32 %v87_v31, %v82_v23 }
  0x83   :  { %v66_v35 = vmul.f32 %v63_v30, %v53_v24 }
  0x85   :  { %v94_v42 = vadd.f32 %v90_v37, %v66_v35 }
  0x86   :  { %v48_v28 = vpop.permute.xlu1 %47  ;;  %v58_v29 = vpop.permute.xlu0 %57 }
  0x87   :  { %v67_v32 = vmul.f32 %v63_v30, %v58_v29  ;;  %v65_v51 = vmul.f32 %v63_v30, %v48_v28 }
  0x89   :  { %v95_v38 = vadd.f32 %v91_v34, %v67_v32 }
  0x8a   :  { %v43_v33 = vpop.permute.xlu0 %42 }
  0x8b   :  { %v74_v36 = vpop.permute.xlu1 %73  ;;  %v64_v40 = vmul.f32 %v63_v30, %v43_v33 }
  0x8c   :  { %v89_v47 = vmul.f32 %v87_v31, %v74_v36 }
  0x8d   :  { %v92_v49 = vadd.f32 %v88_v44, %v64_v40 }
  0x8e   :  { %v118_v39 = vpop.permute.xlu0 %117  ;;  %v93_v54 = vadd.f32 %v89_v47, %v65_v51 }
  0x8f   :  { %v123_v41 = vadd.f32 %v118_v39, %v95_v38 }
  0x90   :  { %v113_v43 = vpop.permute.xlu1 %112 }
  0x91   :  { %v493_v45 = vmul.f32 -1.442695, %v123_v41  ;;  %v122_v46 = vadd.f32 %v113_v43, %v94_v42 }
  0x92   :  { %v175_v14 = vpop.permute.xlu0 %174 }
  0x93   :  { %566 = vpow2.f32 %v493_v45  ;;  %v492_v48 = vmul.f32 -1.442695, %v122_v46 }
  0x94   :  { %v103_v50 = vpop.permute.xlu1 %102 }
  0x95   :  { %568 = vpow2.f32 %v492_v48  ;;  %v120_v52 = vadd.f32 %v103_v50, %v92_v49  ;;  %v565_v48 = vld [vmem:[%s773_s5 + $0x8] sm:$0xff]   ;;  %v638_v49 = vmov 0.0  }
  0x96   :  { %v165_v18 = vpop.permute.xlu0 %164 }
  0x97   :  { %v490_v53 = vmul.f32 -1.442695, %v120_v52 }
  0x98   :  { %v108_v55 = vpop.permute.xlu1 %107 }
  0x99   :  { %570 = vpow2.f32 %v490_v53  ;;  %v121_v56 = vadd.f32 %v108_v55, %v93_v54 }
  0x9a   :  { %v304_v51 = vpop.permute.xlu0 %303 }
  0x9b   :  { %v491_v57 = vmul.f32 -1.442695, %v121_v56 }
  0x9c   :  { %v180_v15 = vpop.permute.xlu1 %179 }
  0x9d   :  { %572 = vpow2.f32 %v491_v57 }
  0xa0   :  { %v567_v58 = vpop.eup %566  ;;  %v170_v25 = vpop.permute.xlu1 %169 }
  0xa1   :  { %v139_v59 = vadd.f32 1.0, %v567_v58 }
  0xa2   :  { %v569_v60 = vpop.eup %568 }
  0xa3   :  { %574 = vrcp.f32 %v139_v59  ;;  %v138_v61 = vadd.f32 1.0, %v569_v60 }
  0xa4   :  { %v299_v50 = vpop.permute.xlu1 %298 }
  0xa5   :  { %576 = vrcp.f32 %v138_v61  ;;  %v294_v61 = vpop.permute.xlu0 %293 }
  0xa6   :  { %v571_v62 = vpop.eup %570 }
  0xa7   :  { %v136_v63 = vadd.f32 1.0, %v571_v62 }
  0xa8   :  { %v289_v54 = vpop.permute.xlu1 %288 }
  0xa9   :  { %578 = vrcp.f32 %v136_v63 }
  0xaa   :  { %v573_v0 = vpop.eup %572 }
  0xab   :  { %v137_v1 = vadd.f32 1.0, %v573_v0 }
  0xad   :  { %580 = vrcp.f32 %v137_v1 }
  0xb0   :  { %v575_v2 = vpop.eup %574 }
  0xb1   :  { %v151_v4 = vmul.f32 %v575_v2, %v123_v41 }
  0xb2   :  { %v577_v3 = vpop.eup %576 }
  0xb3   :  { %v150_v5 = vmul.f32 %v577_v3, %v122_v46 }
  0xb5   :  { %v157_v6 = vpack.c.bf16 %v151_v4, %v150_v5 }
  0xb6   :  { %v579_v7 = vpop.eup %578 }
  0xb7   :  { %524 = vmatprep.subr.bf16.mxu0 %v157_v6  ;;  %v148_v9 = vmul.f32 %v579_v7, %v120_v52 }
  0xb8   :  { %525 = vmatpush3.bf16.msra.mxu0 %v157_v6 }
  0xba   :  { %v581_v8 = vpop.eup %580 }
  0xbb   :  { %v149_v10 = vmul.f32 %v581_v8, %v121_v56 }
  0xbd   :  { %v156_v11 = vpack.c.bf16 %v149_v10, %v148_v9 }
  0xbf   :  { %526 = vmatprep.subr.bf16.mxu0 %v156_v11 }
  0xc0   :  { %527 = vmatpush3.bf16.msra.mxu0 %v156_v11 }
  0xc1   :  { %540 = vmatprep.subr.mxu0 %v638_v49 }
  0xc3   :  { %529 = vmatmul.mubr.msk.bf16.vlgmr.msra.gmra.mxu0 %vm192_vm0, %v563_v12 }
  0xc4   :  { %548 = vmatprep.mubr.msk.f32.mxu0 %vm639_vm1, %v638_v49 }
 0x183   :  { %v530_v16 = vpop.f32.mrf.mxu0 }
 0x184   :  { %v242_v17 = vadd.f32 %v530_v16, %v175_v14 }
 0x185   :  { %v233_v19 = vpop.f32.mrf.mxu0 }
 0x186   :  { %v500_v20 = vmul.f32 -1.442695, %v242_v17  ;;  %v234_v21 = vadd.f32 %v233_v19, %v165_v18  ;;  %v399_v18 = vld [vmem:[%s775_s7] sm:$0x1]  ;;  %v401_v19 = vstv %s776_s8 }
 0x187   :  { %v531_v22 = vpop.f32.mrf.mxu0 }
 0x188   :  { %582 = vpow2.f32 %v500_v20  ;;  %v498_v23 = vmul.f32 -1.442695, %v234_v21  ;;  %v245_v24 = vadd.f32 %v531_v22, %v180_v15 }
 0x189   :  { %v236_v26 = vpop.f32.mrf.mxu0 }
 0x18a   :  { %584 = vpow2.f32 %v498_v23  ;;  %v501_v27 = vmul.f32 -1.442695, %v245_v24  ;;  %v237_v28 = vadd.f32 %v236_v26, %v170_v25 }
 0x18c   :  { %586 = vpow2.f32 %v501_v27  ;;  %v499_v29 = vmul.f32 -1.442695, %v237_v28 }
 0x18e   :  { %588 = vpow2.f32 %v499_v29 }
 0x195   :  { %v583_v30 = vpop.eup %582 }
 0x196   :  { %v262_v31 = vadd.f32 1.0, %v583_v30 }
 0x197   :  { %v585_v32 = vpop.eup %584 }
 0x198   :  { %v260_v33 = vadd.f32 1.0, %v585_v32  ;;  %590 = vrcp.f32 %v262_v31 }
 0x199   :  { %v587_v34 = vpop.eup %586 }
 0x19a   :  { %v263_v35 = vadd.f32 1.0, %v587_v34  ;;  %592 = vrcp.f32 %v260_v33 }
 0x19b   :  { %v589_v36 = vpop.eup %588 }
 0x19c   :  { %594 = vrcp.f32 %v263_v35  ;;  %v261_v37 = vadd.f32 1.0, %v589_v36 }
 0x19e   :  { %596 = vrcp.f32 %v261_v37 }
 0x1a5   :  { %v591_v38 = vpop.eup %590 }
 0x1a6   :  { %v274_v41 = vmul.f32 %v591_v38, %v242_v17 }
 0x1a7   :  { %v593_v39 = vpop.eup %592 }
 0x1a8   :  { %v272_v44 = vmul.f32 %v593_v39, %v234_v21 }
 0x1a9   :  { %v595_v40 = vpop.eup %594 }
 0x1aa   :  { %v275_v42 = vmul.f32 %v595_v40, %v245_v24 }
 0x1ab   :  { %v597_v43 = vpop.eup %596 }
 0x1ac   :  { %v273_v45 = vmul.f32 %v597_v43, %v237_v28  ;;  %v281_v46 = vpack.c.bf16 %v275_v42, %v274_v41 }
 0x1ae   :  { %532 = vmatprep.subr.bf16.mxu1 %v281_v46  ;;  %v280_v47 = vpack.c.bf16 %v273_v45, %v272_v44 }
 0x1af   :  { %533 = vmatpush3.bf16.msra.mxu1 %v281_v46 }
 0x1b0   :  { %534 = vmatprep.subr.bf16.mxu1 %v280_v47 }
 0x1b3   :  { %535 = vmatpush3.bf16.msra.mxu1 %v280_v47 }
 0x1b6   :  { %537 = vmatmul.mubr.msk.bf16.vlgmr.msra.gmra.mxu1 %vm192_vm0, %v565_v48 }
 0x276   :  { %v538_v52 = vpop.f32.mrf.mxu1 }
 0x277   :  { %v365_v53 = vadd.f32 %v538_v52, %v299_v50 }
 0x278   :  { %v356_v55 = vpop.f32.mrf.mxu1 }
 0x279   :  { %v508_v56 = vmul.f32 -1.442695, %v365_v53  ;;  %v357_v57 = vadd.f32 %v356_v55, %v289_v54 }
 0x27a   :  { %v539_v58 = vpop.f32.mrf.mxu1 }
 0x27b   :  { %598 = vpow2.f32 %v508_v56  ;;  %v506_v59 = vmul.f32 -1.442695, %v357_v57  ;;  %v368_v60 = vadd.f32 %v539_v58, %v304_v51 }
 0x27c   :  { %v359_v62 = vpop.f32.mrf.mxu1 }
 0x27d   :  { %v509_v63 = vmul.f32 -1.442695, %v368_v60  ;;  %v360_v0 = vadd.f32 %v359_v62, %v294_v61  ;;  %600 = vpow2.f32 %v506_v59 }
 0x27f   :  { %602 = vpow2.f32 %v509_v63  ;;  %v507_v1 = vmul.f32 -1.442695, %v360_v0 }
 0x281   :  { %604 = vpow2.f32 %v507_v1 }
 0x288   :  { %v599_v2 = vpop.eup %598 }
 0x289   :  { %v385_v3 = vadd.f32 1.0, %v599_v2 }
 0x28a   :  { %v601_v4 = vpop.eup %600 }
 0x28b   :  { %606 = vrcp.f32 %v385_v3  ;;  %v383_v8 = vadd.f32 1.0, %v601_v4 }
 0x28c   :  { %v603_v5 = vpop.eup %602 }
 0x28d   :  { %v386_v6 = vadd.f32 1.0, %v603_v5 }
 0x28e   :  { %v605_v7 = vpop.eup %604 }
 0x28f   :  { %608 = vrcp.f32 %v386_v6  ;;  %v384_v9 = vadd.f32 1.0, %v605_v7 }
 0x291   :  { %610 = vrcp.f32 %v384_v9 }
 0x292   :  { %612 = vrcp.f32 %v383_v8 }
 0x298   :  { %v607_v10 = vpop.eup %606 }
 0x299   :  { %v397_v14 = vmul.f32 %v607_v10, %v365_v53 }
 0x29c   :  { %v609_v11 = vpop.eup %608 }
 0x29d   :  { %v398_v12 = vmul.f32 %v609_v11, %v368_v60 }
 0x29e   :  { %v611_v13 = vpop.eup %610 }
 0x29f   :  { %541 = vmatpush3.msra.mxu0 %v398_v12  ;;  %v613_v15 = vpop.eup %612  ;;  %v396_v16 = vmul.f32 %v611_v13, %v360_v0 }
 0x2a0   :  { %542 = vmatprep.subr.mxu0 %v638_v49  ;;  %v395_v17 = vmul.f32 %v613_v15, %v357_v57 }
 0x2a1   :  { %543 = vmatpush3.msra.mxu0 %v397_v14 }
 0x2a2   :  { %544 = vmatprep.subr.mxu0 %v638_v49 }
 0x2a3   :  { %545 = vmatpush3.msra.mxu0 %v396_v16 }
 0x2a4   :  { %546 = vmatprep.subr.mxu0 %v638_v49 }
 0x2a5   :  { %547 = vmatpush3.msra.mxu0 %v395_v17 }
 0x2a6   :  { %549 = vmatmul.mubr.msk.f32.vlgmr.msra.gmra.mxu0 %vm192_vm0, %v399_v18 }
 0x366   :  { %v471_v20 = vpop.f32.mrf.mxu0 }
 0x367   :  { %v472_v21 = vadd.f32 %v471_v20, %v401_v19 }
 0x368   :  { %v550_v22 = vpop.f32.mrf.mxu0 }
 0x369   :  { %475 = vst [vmem:[#allocation3] sm:$0x1] %v472_v21 }
 0x36a   :  { %625 = shalt.err (!%p622_p4)
}
 0x36b   :  { %485 = dma.vmem_to_hbm [thread:$0]  %s483_s27, 16, %s777_s9, [#allocation4]  }
 0x36c   :  { %634 = dma.done.wait [#allocation4], 16  }
 0x36d   :  { %635 = vsyncadd [#allocation4], 4294967280 }
 0x36e   :  { %489 = vsyncpa [#allocation4], 1 }

</bundles_post_ra>
